<compile_context>
chip_gen: v7x
topology: tpu7x:2x2x1
jax: 0.10.0
libtpu: 0.0.40
codegen_flags: <defaults>
</compile_context>

<pallas_src>
import jax
import jax.numpy as jnp
from jax.experimental import pallas as pl
from jax.experimental.pallas import tpu as pltpu


def _round_up(a, m):
    return (a + m - 1) // m * m


def mlp_sigmoid_kernel(x_ref, c_ref, o_ref):
    # x_ref : (TR, 128) packed f32, lane 8*j + f  = feature f of batch row 16*r + j
    # c_ref : (408, 128) constant slab:
    #         [0:128)   W1p  (block-diag, in->out, 6 valid outs per 8-lane group)
    #         [128:256) W2p  (block-diag, 4 valid outs per group)
    #         [256:384) W3p  (group j -> output lane j, only lanes [0,16) used)
    #         row 384 = b1p, row 392 = b2p, row 400 = b3p (lanes [0,16))
    # o_ref : (TR, 16)  sigmoid output, lane j = batch row 16*r + j
    x = x_ref[...]

    w1 = c_ref[0:128, :]
    w2 = c_ref[128:256, :]
    w3 = c_ref[256:384, :]
    b1 = c_ref[384:385, :]
    b2 = c_ref[392:393, :]
    b3 = c_ref[400:401, 0:16]

    def sigmoid(z):
        # one EUP op per element instead of exp + divide
        return 0.5 * jnp.tanh(0.5 * z) + 0.5

    # Layer 1: packed (TR,128) @ block-diag (128,128)  -> MXU, no relayout.
    h1 = sigmoid(jnp.dot(x, w1, preferred_element_type=jnp.float32) + b1)
    # Padded lanes (o=6,7 per group) hold sigmoid(0)=0.5 but W2p rows there are 0.

    # Layer 2.
    h2 = sigmoid(jnp.dot(h1, w2, preferred_element_type=jnp.float32) + b2)

    # Layer 3 + per-row output selection fused into W3p; keep first 16 lanes.
    z3 = jnp.dot(h2, w3, preferred_element_type=jnp.float32)[:, 0:16] + b3
    o_ref[...] = sigmoid(z3).astype(o_ref.dtype)


def _pack_params(w1, b1, w2, b2, w3, b3):
    """Build the single (408,128) constant slab of block-diagonal weights + biases."""
    f32 = jnp.float32
    eye16 = jnp.eye(16, dtype=f32)
    # Per-8-lane-group blocks, weights transposed to (in, out) and zero-padded.
    a1 = jnp.pad(w1.astype(f32).T, ((0, 0), (0, 2)))   # (8,8): in 8, out 6->8
    a2 = jnp.pad(w2.astype(f32).T, ((0, 2), (0, 4)))   # (8,8): in 6->8, out 4->8
    a3 = jnp.pad(w3.astype(f32).T, ((0, 4), (0, 0)))   # (8,1): in 4->8, out 1
    w1p = jnp.kron(eye16, a1)                                    # (128,128)
    w2p = jnp.kron(eye16, a2)                                    # (128,128)
    w3p = jnp.pad(jnp.kron(eye16, a3), ((0, 0), (0, 112)))       # (128,16)->(128,128)
    b1p = jnp.tile(jnp.pad(b1.astype(f32), (0, 2)), 16)          # (128,)
    b2p = jnp.tile(jnp.pad(b2.astype(f32), (0, 4)), 16)          # (128,)
    b3p = jnp.pad(jnp.broadcast_to(b3.astype(f32), (16,)), (0, 112))  # (128,)
    z7 = jnp.zeros((7, 128), f32)
    return jnp.concatenate(
        [w1p, w2p, w3p, b1p[None], z7, b2p[None], z7, b3p[None], z7], axis=0)  # (408,128)


def logistic_regression_forward(x, params, *, rows_per_tile=4096):
    """x: [B, 8] float32. params: dict of (W, b) per layer, PyTorch layout W=[out,in].

    rows_per_tile = packed rows (16 batch rows each) per grid step; default 4096
    -> 65,536 batch rows / 2 MiB of x per step.
    """
    w1, b1 = params["linear1"]
    w2, b2 = params["linear2"]
    w3, b3 = params["linear3"]

    B, F = x.shape
    assert F == 8, F
    x = x.astype(jnp.float32)

    # Pad the batch only as much as needed: to a multiple of 16 so that
    # (B,8) -> (B/16,128) is a pure (free) reshape of contiguous data; tiny
    # batches go to 128 so the packed view spans full (8,128) tiles.
    b_pad = 128 if B < 128 else _round_up(B, 16)
    if b_pad != B:
        x = jnp.pad(x, ((0, b_pad - B), (0, 0)))   # tiny-B / remainder-only pad
    r_total = b_pad // 16
    x_lanes = x.reshape(r_total, 128)              # free reshape, lane-dense rows

    # Packed rows per block: large (amortize per-step overhead), multiple of 8,
    # capped for VMEM, and sized so the grid has >= 2 steps when possible so the
    # "parallel" batch axis actually splits across both v7x TensorCores.
    tr_cap = max(8, _round_up(rows_per_tile, 8))
    tr = min(tr_cap, max(8, _round_up(pl.cdiv(r_total, 2), 8)))
    grid = (pl.cdiv(r_total, tr),)                 # non-divisible tail handled by Pallas

    consts = _pack_params(w1, b1, w2, b2, w3, b3)  # (408,128), ~200 KiB

    out = pl.pallas_call(
        mlp_sigmoid_kernel,
        out_shape=jax.ShapeDtypeStruct((r_total, 16), jnp.float32),
        grid=grid,
        in_specs=[
            pl.BlockSpec((tr, 128), lambda i: (i, 0)),    # streamed lane-dense x
            pl.BlockSpec((408, 128), lambda i: (0, 0)),   # VMEM-resident const slab
        ],
        out_specs=pl.BlockSpec((tr, 16), lambda i: (i, 0)),
        compiler_params=pltpu.CompilerParams(
            dimension_semantics=("parallel",),
            vmem_limit_bytes=48 * 1024 * 1024),
    )(x_lanes, consts)

    # (r_total,16) -> flat batch order -> (B,1); reshape is free, slice is tiny.
    return out.reshape(-1)[:B].reshape(B, 1)


def init_params(key):
    """Deterministic init matching torch.nn.Linear shapes (W=[out,in], b=[out])."""
    dims = [(6, 8), (4, 6), (1, 4)]
    names = ["linear1", "linear2", "linear3"]
    params = {}
    for name, (out_f, in_f) in zip(names, dims):
        key, kw, kb = jax.random.split(key, 3)
        bound = 1.0 / (in_f ** 0.5)  # torch default: U(-1/sqrt(in), 1/sqrt(in))
        w = jax.random.uniform(kw, (out_f, in_f), jnp.float32, -bound, bound)
        b = jax.random.uniform(kb, (out_f,), jnp.float32, -bound, bound)
        params[name] = (w, b)
    return params


def reference_forward(x, params):
    h = x
    for name in ["linear1", "linear2", "linear3"]:
        w, b = params[name]
        h = jax.nn.sigmoid(h @ w.T + b)
    return h


if __name__ == "__main__":
    key = jax.random.PRNGKey(0)
    key, kx = jax.random.split(key)
    params = init_params(key)

    # Small canonical case (batch=8, features=8).
    batch = 8
    x = jax.random.normal(kx, (batch, 8), jnp.float32)
    out = jax.block_until_ready(logistic_regression_forward(x, params))
    ref = reference_forward(x, params)
    assert out.shape == (batch, 1), out.shape
    assert jnp.allclose(out, ref, atol=1e-5, rtol=1e-4), "mismatch vs reference (B=8)"

    # Also exercise the multi-tile + non-divisible boundary path once.
    key, kx2 = jax.random.split(key)
    batch2 = 300
    x2 = jax.random.normal(kx2, (batch2, 8), jnp.float32)
    out2 = jax.block_until_ready(logistic_regression_forward(x2, params, rows_per_tile=16))
    ref2 = reference_forward(x2, params)
    assert out2.shape == (batch2, 1), out2.shape
    assert jnp.allclose(out2, ref2, atol=1e-5, rtol=1e-4), "mismatch vs reference (B=300)"

    print("KERNEL_OK")
</pallas_src>

<mosaic_0001>
module attributes {stable_mosaic.version = 11 : i64} {
  func.func @mlp_sigmoid_kernel(%arg0: i32, %arg1: memref<8x128xf32, #tpu.memory_space<vmem>>, %arg2: memref<408x128xf32, #tpu.memory_space<vmem>>, %arg3: memref<8x16xf32, #tpu.memory_space<vmem>>) attributes {dimension_semantics = [#tpu.dimension_semantics<parallel>], iteration_bounds = array<i64: 1>, scalar_prefetch = 0 : i64, scratch_operands = 0 : i64, tpu.core_type = #tpu.core_type<tc>, window_params = [{transform_indices = @transform_0, window_bounds = array<i64: 8, 128>}, {pipeline_mode = #tpu.pipeline_mode<synchronous>, transform_indices = @transform_1, window_bounds = array<i64: 408, 128>}, {transform_indices = @transform_2, window_bounds = array<i64: 8, 16>}]} {
    %c0 = arith.constant 0 : index
    %c0_0 = arith.constant 0 : index
    %0 = vector.load %arg1[%c0, %c0_0] : memref<8x128xf32, #tpu.memory_space<vmem>>, vector<8x128xf32>
    %c0_1 = arith.constant 0 : index
    %c0_2 = arith.constant 0 : index
    %1 = vector.load %arg2[%c0_1, %c0_2] : memref<408x128xf32, #tpu.memory_space<vmem>>, vector<128x128xf32>
    %c128 = arith.constant 128 : index
    %c0_3 = arith.constant 0 : index
    %2 = vector.load %arg2[%c128, %c0_3] : memref<408x128xf32, #tpu.memory_space<vmem>>, vector<128x128xf32>
    %c256 = arith.constant 256 : index
    %c0_4 = arith.constant 0 : index
    %3 = vector.load %arg2[%c256, %c0_4] : memref<408x128xf32, #tpu.memory_space<vmem>>, vector<128x128xf32>
    %c384 = arith.constant 384 : index
    %c0_5 = arith.constant 0 : index
    %4 = vector.load %arg2[%c384, %c0_5] : memref<408x128xf32, #tpu.memory_space<vmem>>, vector<1x128xf32>
    %c392 = arith.constant 392 : index
    %c0_6 = arith.constant 0 : index
    %5 = vector.load %arg2[%c392, %c0_6] : memref<408x128xf32, #tpu.memory_space<vmem>>, vector<1x128xf32>
    %c400 = arith.constant 400 : index
    %c0_7 = arith.constant 0 : index
    %6 = vector.load %arg2[%c400, %c0_7] : memref<408x128xf32, #tpu.memory_space<vmem>>, vector<1x16xf32>
    %cst = arith.constant dense<0.000000e+00> : vector<8x128xf32>
    %7 = tpu.matmul %0, %1, %cst {dimension_numbers = #tpu.dot_dimension_numbers<[1], [0], [0], [1], [0, 0, 1, 1], [], []>} : vector<8x128xf32>, vector<128x128xf32>, vector<8x128xf32> -> vector<8x128xf32>
    %8 = vector.broadcast %4 : vector<1x128xf32> to vector<8x128xf32>
    %9 = arith.addf %7, %8 : vector<8x128xf32>
    %cst_8 = arith.constant 5.000000e-01 : f32
    %10 = vector.broadcast %cst_8 : f32 to vector<8x128xf32>
    %11 = arith.mulf %10, %9 : vector<8x128xf32>
    %12 = math.tanh %11 : vector<8x128xf32>
    %cst_9 = arith.constant 5.000000e-01 : f32
    %13 = vector.broadcast %cst_9 : f32 to vector<8x128xf32>
    %14 = arith.mulf %13, %12 : vector<8x128xf32>
    %cst_10 = arith.constant 5.000000e-01 : f32
    %15 = vector.broadcast %cst_10 : f32 to vector<8x128xf32>
    %16 = arith.addf %14, %15 : vector<8x128xf32>
    %cst_11 = arith.constant dense<0.000000e+00> : vector<8x128xf32>
    %17 = tpu.matmul %16, %2, %cst_11 {dimension_numbers = #tpu.dot_dimension_numbers<[1], [0], [0], [1], [0, 0, 1, 1], [], []>} : vector<8x128xf32>, vector<128x128xf32>, vector<8x128xf32> -> vector<8x128xf32>
    %18 = vector.broadcast %5 : vector<1x128xf32> to vector<8x128xf32>
    %19 = arith.addf %17, %18 : vector<8x128xf32>
    %cst_12 = arith.constant 5.000000e-01 : f32
    %20 = vector.broadcast %cst_12 : f32 to vector<8x128xf32>
    %21 = arith.mulf %20, %19 : vector<8x128xf32>
    %22 = math.tanh %21 : vector<8x128xf32>
    %cst_13 = arith.constant 5.000000e-01 : f32
    %23 = vector.broadcast %cst_13 : f32 to vector<8x128xf32>
    %24 = arith.mulf %23, %22 : vector<8x128xf32>
    %cst_14 = arith.constant 5.000000e-01 : f32
    %25 = vector.broadcast %cst_14 : f32 to vector<8x128xf32>
    %26 = arith.addf %24, %25 : vector<8x128xf32>
    %cst_15 = arith.constant dense<0.000000e+00> : vector<8x128xf32>
    %27 = tpu.matmul %26, %3, %cst_15 {dimension_numbers = #tpu.dot_dimension_numbers<[1], [0], [0], [1], [0, 0, 1, 1], [], []>} : vector<8x128xf32>, vector<128x128xf32>, vector<8x128xf32> -> vector<8x128xf32>
    %28 = vector.extract_strided_slice %27 {offsets = [0, 0], sizes = [8, 16], strides = [1, 1]} : vector<8x128xf32> to vector<8x16xf32>
    %29 = vector.broadcast %6 : vector<1x16xf32> to vector<8x16xf32>
    %30 = arith.addf %28, %29 : vector<8x16xf32>
    %cst_16 = arith.constant 5.000000e-01 : f32
    %31 = vector.broadcast %cst_16 : f32 to vector<8x16xf32>
    %32 = arith.mulf %31, %30 : vector<8x16xf32>
    %33 = math.tanh %32 : vector<8x16xf32>
    %cst_17 = arith.constant 5.000000e-01 : f32
    %34 = vector.broadcast %cst_17 : f32 to vector<8x16xf32>
    %35 = arith.mulf %34, %33 : vector<8x16xf32>
    %cst_18 = arith.constant 5.000000e-01 : f32
    %36 = vector.broadcast %cst_18 : f32 to vector<8x16xf32>
    %37 = arith.addf %35, %36 : vector<8x16xf32>
    %c0_19 = arith.constant 0 : index
    %c0_20 = arith.constant 0 : index
    %38 = vector.load %arg3[%c0_19, %c0_20] : memref<8x16xf32, #tpu.memory_space<vmem>>, vector<8x16xf32>
    tpu.vector_store %arg3[%c0_19, %c0_20], %37 {strides = array<i32>} : memref<8x16xf32, #tpu.memory_space<vmem>>, vector<8x16xf32>,
    return
  }
  func.func @transform_0(%arg0: i32) -> (i32, i32) {
    %c0_i32 = arith.constant 0 : i32
    %c0_i32_0 = arith.constant 0 : i32
    return %arg0, %c0_i32 : i32, i32
  }
  func.func @transform_1(%arg0: i32) -> (i32, i32) {
    %c0_i32 = arith.constant 0 : i32
    %c0_i32_0 = arith.constant 0 : i32
    %c0_i32_1 = arith.constant 0 : i32
    return %c0_i32, %c0_i32_0 : i32, i32
  }
  func.func @transform_2(%arg0: i32) -> (i32, i32) {
    %c0_i32 = arith.constant 0 : i32
    %c0_i32_0 = arith.constant 0 : i32
    return %arg0, %c0_i32 : i32, i32
  }
}

</mosaic_0001>

<bundles_post_ra>
// kernel: tpu_custom_call.1
= control target key start
LH: loop header
LB: loop body
LE: loop exit
PB: predicated region body
PF: predicated region fallthrough
CT: control target
= control target key end

     0   :  { %7 = vsyncpa [#allocation3], 0  ;;  %s753_s0 = inlined_call_operand.hbm [shape: f32[8,128], index: 0, kind: input, shape index: {}]   ;;  %s754_s1 = inlined_call_operand.hbm [shape: f32[408,128], index: 1, kind: input, shape index: {}]   ;;  %s755_s2 = inlined_call_operand.hbm [shape: f32[8,16], index: 2, kind: output, shape index: {}]  }
   0x1   :  { %8 = vsyncpa [#allocation6], 0 }
   0x2   :  { %9 = vsyncpa [#allocation4], 0  ;;  %s660_s9 = smov [#allocation2]   ;;  %s661_s11 = smov [#allocation5]  }
   0x3   :  { %s16_s10 = sshll.u32 %s660_s9, 4  ;;  %s25_s12 = sshll.u32 %s661_s11, 4  ;;  %s17_s10 = int_to_ptr.vmem [resolvable:$true] %s16_s10  ;;  %s683_s12 = int_to_ptr.vmem [resolvable:$true] %s25_s12 }
   0x4   :  { %s588_s15 = scalar_lea.hbm %s753_s0, 128 }
   0x5   :  { %p589_p0 = scmp.ne.s32.totalorder %s753_s0, %s588_s15  ;;  %p592_p1 = scmp.lt.u32.totalorder %s588_s15, %s753_s0 }
   0x7   :  { %p594_p2 = pnand %p592_p1, %p589_p0 }
   0x9   :  { %597 = shalt.err (!%p594_p2)
}
   0xa   :  { %s598_s20 = scalar_lea.vmem %s17_s10, 128  ;;  %p603_p4 = scmp.lt.s32.totalorder %s17_s10, %s17_s10 }
   0xb   :  { %p599_p3 = scmp.ne.s32.totalorder %s17_s10, %s598_s20  ;;  %p604_p5 = scmp.lt.s32.totalorder %s598_s20, %s598_s20 }
   0xd   :  { %p605_p6 = por %p604_p5, %p603_p4 }
   0xf   :  { %p606_p7 = pnand %p605_p6, %p599_p3 }
  0x11   :  { %609 = shalt.err (!%p606_p7)
}
  0x12   :  { %19 = dma.hbm_to_vmem [thread:$0]  %s753_s0, 128, %s17_s10, [#allocation3]  }
  0x13   :  { %s610_s25 = scalar_lea.hbm %s754_s1, 6528 }
  0x14   :  { %p611_p8 = scmp.ne.s32.totalorder %s754_s1, %s610_s25  ;;  %p614_p9 = scmp.lt.u32.totalorder %s610_s25, %s754_s1 }
  0x16   :  { %p616_p10 = pnand %p614_p9, %p611_p8 }
  0x18   :  { %619 = shalt.err (!%p616_p10)
}
  0x19   :  { %s620_s30 = scalar_lea.vmem %s683_s12, 6528  ;;  %p625_p12 = scmp.lt.s32.totalorder %s683_s12, %s683_s12 }
  0x1a   :  { %p621_p11 = scmp.ne.s32.totalorder %s683_s12, %s620_s30  ;;  %p626_p13 = scmp.lt.s32.totalorder %s620_s30, %s620_s30 }
  0x1c   :  { %p627_p0 = por %p626_p13, %p625_p12 }
  0x1e   :  { %p628_p1 = pnand %p627_p0, %p621_p11 }
  0x20   :  { %631 = shalt.err (!%p628_p1)
}
  0x21   :  { %s662_s0 = smov 128   ;;  %s663_s3 = smov 8  }
  0x22   :  { %31 = dma.hbm_to_vmem [thread:$0]  %s754_s1, 6528, %s683_s12, [#allocation6], %s662_s0, %s662_s0, %s663_s3  }
  0x23   :  { %654 = dma.done.wait [#allocation3], 128  }
  0x24   :  { %655 = vsyncadd [#allocation3], 4294967168 }
  0x25   :  { %656 = dma.done.wait [#allocation6], 6528  }
  0x26   :  { %657 = vsyncadd [#allocation6], 4294960768  ;;  %v664_v0 = vmov 0.0|0.0   ;;  %vm665_vm0 = vmmov 0   ;;  %v666_v1 = vmov 0.0   ;;  %v39_v2 = vld [vmem:[#allocation5] sm:$0xff] }
  0x27   :  { %502 = vmatprep.subr.bf16.mxu0 %v664_v0  ;;  %429 = vmatprep.mubr.msk.f32.mxu0 %vm665_vm0, %v666_v1  ;;  %v40_v3 = vld [vmem:[#allocation5 + $0x8] sm:$0xff]  ;;  %v41_v4 = vld [vmem:[#allocation5 + $0x10] sm:$0xff]  ;;  %v42_v6 = vld [vmem:[#allocation5 + $0x18] sm:$0xff]  ;;  %s667_s1 = smov [#allocation7]   ;;  %vm325_vm1 = vcmask 130048  }
  0x28   :  { %526 = vmatprep.subr.bf16.mxu1 %v664_v0  ;;  %464 = vmatprep.mubr.msk.f32.mxu1 %vm665_vm0, %v666_v1  ;;  %v503_v5 = vpack.c.bf16 %v40_v3, %v39_v2  ;;  %v506_v7 = vpack.c.bf16 %v42_v6, %v41_v4  ;;  %v43_v8 = vld [vmem:[#allocation5 + $0x20] sm:$0xff]  ;;  %v44_v9 = vld [vmem:[#allocation5 + $0x28] sm:$0xff]  ;;  %v57_v12 = vld [vmem:[#allocation5 + $0x90] sm:$0xff]  ;;  %s333_s6 = sshll.u32 %s667_s1, 4  ;;  %s334_s6 = int_to_ptr.vmem [resolvable:$true] %s333_s6 }
  0x29   :  { %v55_v10 = vld [vmem:[#allocation5 + $0x80] sm:$0xff]  ;;  %v56_v11 = vld [vmem:[#allocation5 + $0x88] sm:$0xff]  ;;  %v58_v13 = vld [vmem:[#allocation5 + $0x98] sm:$0xff]  ;;  %v509_v14 = vpack.c.bf16 %v44_v9, %v43_v8  ;;  %s632_s7 = scalar_lea.vmem %s334_s6, 128  ;;  %p637_p3 = scmp.lt.s32.totalorder %s334_s6, %s334_s6 }
  0x2a   :  { %504 = vmatpush3.bf16.msra.mxu0 %v503_v5  ;;  %v527_v15 = vpack.c.bf16 %v56_v11, %v55_v10  ;;  %v45_v16 = vld [vmem:[#allocation5 + $0x30] sm:$0xff]  ;;  %v46_v17 = vld [vmem:[#allocation5 + $0x38] sm:$0xff]  ;;  %v530_v18 = vpack.c.bf16 %v58_v13, %v57_v12  ;;  %v59_v19 = vld [vmem:[#allocation5 + $0xa0] sm:$0xff]  ;;  %p633_p2 = scmp.ne.s32.totalorder %s334_s6, %s632_s7  ;;  %p638_p4 = scmp.lt.s32.totalorder %s632_s7, %s632_s7 }
  0x2b   :  { %505 = vmatprep.subr.bf16.mxu0 %v664_v0  ;;  %v60_v20 = vld [vmem:[#allocation5 + $0xa8] sm:$0xff]  ;;  %v512_v21 = vpack.c.bf16 %v46_v17, %v45_v16  ;;  %v47_v22 = vld [vmem:[#allocation5 + $0x40] sm:$0xff]  ;;  %v49_v26 = vld [vmem:[#allocation5 + $0x50] sm:$0xff] }
  0x2c   :  { %528 = vmatpush3.bf16.msra.mxu1 %v527_v15  ;;  %v48_v23 = vld [vmem:[#allocation5 + $0x48] sm:$0xff]  ;;  %v533_v24 = vpack.c.bf16 %v60_v20, %v59_v19  ;;  %v50_v27 = vld [vmem:[#allocation5 + $0x58] sm:$0xff]  ;;  %v51_v29 = vld [vmem:[#allocation5 + $0x60] sm:$0xff]  ;;  %p639_p5 = por %p638_p4, %p637_p3 }
  0x2d   :  { %529 = vmatprep.subr.bf16.mxu1 %v664_v0  ;;  %v515_v25 = vpack.c.bf16 %v48_v23, %v47_v22  ;;  %v518_v28 = vpack.c.bf16 %v50_v27, %v49_v26  ;;  %v52_v30 = vld [vmem:[#allocation5 + $0x68] sm:$0xff]  ;;  %v53_v32 = vld [vmem:[#allocation5 + $0x70] sm:$0xff]  ;;  %v54_v33 = vld [vmem:[#allocation5 + $0x78] sm:$0xff] }
  0x2e   :  { %507 = vmatpush3.bf16.msra.mxu0 %v506_v7  ;;  %v521_v31 = vpack.c.bf16 %v52_v30, %v51_v29  ;;  %v524_v34 = vpack.c.bf16 %v54_v33, %v53_v32  ;;  %v38_v35 = vld [vmem:[#allocation2] sm:$0xff]  ;;  %v61_v36 = vld [vmem:[#allocation5 + $0xb0] sm:$0xff]  ;;  %v63_v39 = vld [vmem:[#allocation5 + $0xc0] sm:$0xff]  ;;  %p640_p6 = pnand %p639_p5, %p633_p2 }
  0x2f   :  { %508 = vmatprep.subr.bf16.mxu0 %v664_v0  ;;  %v62_v37 = vld [vmem:[#allocation5 + $0xb8] sm:$0xff]  ;;  %v64_v40 = vld [vmem:[#allocation5 + $0xc8] sm:$0xff]  ;;  %v65_v42 = vld [vmem:[#allocation5 + $0xd0] sm:$0xff] }
  0x30   :  { %531 = vmatpush3.bf16.msra.mxu1 %v530_v18  ;;  %v536_v38 = vpack.c.bf16 %v62_v37, %v61_v36  ;;  %v539_v41 = vpack.c.bf16 %v64_v40, %v63_v39  ;;  %v66_v43 = vld [vmem:[#allocation5 + $0xd8] sm:$0xff]  ;;  %v67_v45 = vld [vmem:[#allocation5 + $0xe0] sm:$0xff]  ;;  %v68_v46 = vld [vmem:[#allocation5 + $0xe8] sm:$0xff] }
  0x31   :  { %532 = vmatprep.subr.bf16.mxu1 %v664_v0  ;;  %v542_v44 = vpack.c.bf16 %v66_v43, %v65_v42  ;;  %v545_v47 = vpack.c.bf16 %v68_v46, %v67_v45  ;;  %v69_v48 = vld [vmem:[#allocation5 + $0xf0] sm:$0xff]  ;;  %v70_v49 = vld [vmem:[#allocation5 + $0xf8] sm:$0xff]  ;;  %v71_v51 = vld [vmem:[#allocation5 + $0x100] sm:$0xff] }
  0x32   :  { %510 = vmatpush3.bf16.msra.mxu0 %v509_v14  ;;  %v548_v50 = vpack.c.bf16 %v70_v49, %v69_v48  ;;  %v72_v52 = vld [vmem:[#allocation5 + $0x108] sm:$0xff]  ;;  %v73_v53 = vld [vmem:[#allocation5 + $0x110] sm:$0xff]  ;;  %v74_v55 = vld [vmem:[#allocation5 + $0x118] sm:$0xff] }
  0x33   :  { %511 = vmatprep.subr.bf16.mxu0 %v664_v0  ;;  %v551_v54 = vpack.c.bf16 %v72_v52, %v71_v51  ;;  %v554_v56 = vpack.c.bf16 %v74_v55, %v73_v53  ;;  %v75_v57 = vld [vmem:[#allocation5 + $0x120] sm:$0xff]  ;;  %v76_v58 = vld [vmem:[#allocation5 + $0x128] sm:$0xff]  ;;  %v77_v5 = vld [vmem:[#allocation5 + $0x130] sm:$0xff] }
  0x34   :  { %534 = vmatpush3.bf16.msra.mxu1 %v533_v24  ;;  %v557_v59 = vpack.c.bf16 %v76_v58, %v75_v57  ;;  %v343_v60 = vld [vmem:[#allocation5 + $0x180] ss:$0 sm:$0xff]  ;;  %v78_v6 = vld [vmem:[#allocation5 + $0x138] sm:$0xff]  ;;  %v80_v9 = vld [vmem:[#allocation5 + $0x148] sm:$0xff] }
  0x35   :  { %535 = vmatprep.subr.bf16.mxu1 %v664_v0  ;;  %v560_v7 = vpack.c.bf16 %v78_v6, %v77_v5  ;;  %v79_v8 = vld [vmem:[#allocation5 + $0x140] sm:$0xff]  ;;  %v81_v11 = vld [vmem:[#allocation5 + $0x150] sm:$0xff]  ;;  %v82_v12 = vld [vmem:[#allocation5 + $0x158] sm:$0xff] }
  0x36   :  { %513 = vmatpush3.bf16.msra.mxu0 %v512_v21  ;;  %v563_v10 = vpack.c.bf16 %v80_v9, %v79_v8  ;;  %v566_v13 = vpack.c.bf16 %v82_v12, %v81_v11  ;;  %v83_v14 = vld [vmem:[#allocation5 + $0x160] sm:$0xff]  ;;  %v84_v15 = vld [vmem:[#allocation5 + $0x168] sm:$0xff]  ;;  %v85_v17 = vld [vmem:[#allocation5 + $0x170] sm:$0xff] }
  0x37   :  { %514 = vmatprep.subr.bf16.mxu0 %v664_v0  ;;  %v569_v16 = vpack.c.bf16 %v84_v15, %v83_v14  ;;  %v86_v18 = vld [vmem:[#allocation5 + $0x178] sm:$0xff]  ;;  %v344_v20 = vld [vmem:[#allocation5 + $0x188] ss:$0 sm:$0xff] }
  0x38   :  { %537 = vmatpush3.bf16.msra.mxu1 %v536_v38  ;;  %v572_v19 = vpack.c.bf16 %v86_v18, %v85_v17 }
  0x39   :  { %538 = vmatprep.subr.bf16.mxu1 %v664_v0 }
  0x3a   :  { %516 = vmatpush3.bf16.msra.mxu0 %v515_v25 }
  0x3b   :  { %517 = vmatprep.subr.bf16.mxu0 %v664_v0 }
  0x3c   :  { %540 = vmatpush3.bf16.msra.mxu1 %v539_v41 }
  0x3d   :  { %541 = vmatprep.subr.bf16.mxu1 %v664_v0 }
  0x3e   :  { %519 = vmatpush3.bf16.msra.mxu0 %v518_v28  ;;  %v345_v28 = vld [vmem:[#allocation5 + $0x190] ss:$0 sm:$0xff] }
  0x3f   :  { %520 = vmatprep.subr.bf16.mxu0 %v664_v0 }
  0x40   :  { %543 = vmatpush3.bf16.msra.mxu1 %v542_v44 }
  0x41   :  { %544 = vmatprep.subr.bf16.mxu1 %v664_v0 }
  0x42   :  { %522 = vmatpush3.bf16.msra.mxu0 %v521_v31 }
  0x43   :  { %523 = vmatprep.subr.bf16.mxu0 %v664_v0 }
  0x44   :  { %546 = vmatpush3.bf16.msra.mxu1 %v545_v47 }
  0x45   :  { %547 = vmatprep.subr.bf16.mxu1 %v664_v0 }
  0x46   :  { %525 = vmatpush3.bf16.msra.mxu0 %v524_v34 }
  0x47   :  { %550 = vmatprep.subr.bf16.mxu0 %v664_v0 }
  0x48   :  { %549 = vmatpush3.bf16.msra.mxu1 %v548_v50 }
  0x49   :  { %430 = vmatmul.mubr.f32.vlgmr.msra.gmra.mrb[0].mxu0 %v38_v35 }
  0x4a   :  { %499 = vmatprep.mubr.msk.f32.mxu0 %vm665_vm0, %v666_v1  ;;  %552 = vmatpush3.bf16.msra.mxu0 %v551_v54 }
  0x4b   :  { %553 = vmatprep.subr.bf16.mxu0 %v664_v0 }
  0x4e   :  { %555 = vmatpush3.bf16.msra.mxu0 %v554_v56 }
  0x4f   :  { %556 = vmatprep.subr.bf16.mxu0 %v664_v0 }
  0x52   :  { %558 = vmatpush3.bf16.msra.mxu0 %v557_v59 }
  0x53   :  { %559 = vmatprep.subr.bf16.mxu0 %v664_v0 }
  0x56   :  { %561 = vmatpush3.bf16.msra.mxu0 %v560_v7 }
  0x57   :  { %562 = vmatprep.subr.bf16.mxu0 %v664_v0 }
  0x5a   :  { %564 = vmatpush3.bf16.msra.mxu0 %v563_v10 }
  0x5b   :  { %565 = vmatprep.subr.bf16.mxu0 %v664_v0 }
  0x5e   :  { %567 = vmatpush3.bf16.msra.mxu0 %v566_v13 }
  0x5f   :  { %568 = vmatprep.subr.bf16.mxu0 %v664_v0 }
  0x62   :  { %570 = vmatpush3.bf16.msra.mxu0 %v569_v16 }
  0x63   :  { %571 = vmatprep.subr.bf16.mxu0 %v664_v0 }
  0x66   :  { %573 = vmatpush3.bf16.msra.mxu0 %v572_v19 }
 0x11c   :  { %v160_v61 = vpop.f32.mrb[0].mxu0 }
 0x11d   :  { %v161_v62 = vadd.f32 %v343_v60, %v160_v61  ;;  %v431_v63 = vpop.f32.mrb[1].mxu0 }
 0x11f   :  { %v164_v1 = vmul.f32 0.5, %v161_v62 }
 0x121   :  { %582 = vtanh.f32 %v164_v1 }
 0x12b   :  { %v583_v2 = vpop.eup %582 }
 0x12c   :  { %v166_v3 = vmul.f32 0.5, %v583_v2 }
 0x12e   :  { %v167_v4 = vadd.f32 0.5, %v166_v3 }
 0x130   :  { %465 = vmatmul.mubr.f32.vlgmr.msra.gmra.mrb[0].mxu1 %v167_v4 }
 0x203   :  { %v238_v21 = vpop.f32.mrb[0].mxu1 }
 0x204   :  { %v239_v22 = vadd.f32 %v344_v20, %v238_v21  ;;  %v466_v23 = vpop.f32.mrb[1].mxu1 }
 0x206   :  { %v242_v24 = vmul.f32 0.5, %v239_v22 }
 0x208   :  { %584 = vtanh.f32 %v242_v24 }
 0x212   :  { %v585_v25 = vpop.eup %584 }
 0x213   :  { %v244_v26 = vmul.f32 0.5, %v585_v25 }
 0x215   :  { %v245_v27 = vadd.f32 0.5, %v244_v26 }
 0x217   :  { %500 = vmatmul.mubr.f32.vlgmr.msra.gmra.mrb[2].mxu0 %v245_v27 }
 0x2ea   :  { %v312_v29 = vpop.f32.mrb[2].mxu0 }
 0x2eb   :  { %v320_v30 = vadd.f32 %v345_v28, %v312_v29  ;;  %v501_v31 = vpop.f32.mrb[3].mxu0 }
 0x2ed   :  { %v321_v32 = vmul.f32 0.5, %v320_v30 }
 0x2ef   :  { %586 = vtanh.f32 %v321_v32 }
 0x2f9   :  { %v587_v0 = vpop.eup %586 }
 0x2fa   :  { %v323_v33 = vmul.f32 0.5, %v587_v0 }
 0x2fc   :  { %v324_v34 = vadd.f32 0.5, %v323_v33 }
 0x2fe   :  { %326 = vst.msk [vmem:[#allocation7] sm:$0xff] %vm325_vm1, %v324_v34 }
 0x2ff   :  { %643 = shalt.err (!%p640_p6)
}
 0x300   :  { %s644_s10 = scalar_lea.hbm %s755_s2, 128 }
 0x301   :  { %p645_p7 = scmp.ne.s32.totalorder %s755_s2, %s644_s10  ;;  %p648_p8 = scmp.lt.u32.totalorder %s644_s10, %s755_s2 }
 0x303   :  { %p650_p9 = pnand %p648_p8, %p645_p7 }
 0x305   :  { %653 = shalt.err (!%p650_p9)
}
 0x306   :  { %336 = dma.vmem_to_hbm [thread:$0]  %s334_s6, 128, %s755_s2, [#allocation4]  }
 0x307   :  { %658 = dma.done.wait [#allocation4], 128  }
 0x308   :  { %659 = vsyncadd [#allocation4], 4294967168 }
 0x309   :  { %340 = vsyncpa [#allocation3], 1 }
 0x30a   :  { %341 = vsyncpa [#allocation6], 1 }
 0x30b   :  { %342 = vsyncpa [#allocation4], 1 }

</bundles_post_ra>
